<compile_context>
chip_gen: v7x
topology: tpu7x:2x2x1
jax: 0.10.0
libtpu: 0.0.40
codegen_flags: <defaults>
</compile_context>

<pallas_src>
import jax
import jax.numpy as jnp
from jax.experimental import pallas as pl
from jax.experimental.pallas import tpu as pltpu


def _round_up(x, m):
    return ((x + m - 1) // m) * m


def linear_kernel(x_ref, w_ref, b_ref, o_ref, acc_ref):
    k = pl.program_id(2)

    @pl.when(k == 0)
    def _init():
        acc_ref[...] = jnp.zeros_like(acc_ref)

    # Pure MXU accumulate in the K loop (bf16 operands, f32 accumulator).
    acc_ref[...] += jnp.dot(x_ref[...], w_ref[...],
                            preferred_element_type=jnp.float32)

    @pl.when(k == pl.num_programs(2) - 1)
    def _epilogue():
        # Bias is added exactly once, in the epilogue (not per K iteration).
        o_ref[...] = (acc_ref[...] + b_ref[...]).astype(o_ref.dtype)


def simple_classifier_forward(x, weight, bias, *,
                              tm=256, tn=512, tk=512,
                              operand_dtype=jnp.bfloat16):
    """y = x @ weight.T + bias  — forward of torch.nn.Linear(embed, classes).

    x:      [B, E]   activations
    weight: [C, E]   PyTorch Linear weight layout
    bias:   [C]
    """
    B, E = x.shape
    C, E2 = weight.shape
    assert E == E2 and bias.shape == (C,)
    out_dtype = x.dtype

    # Pre-transpose weight to [E, C] so the kernel is a plain row-major GEMM.
    w_t = jnp.transpose(weight)

    # bf16 operands for the MXU; accumulation stays f32 inside the kernel.
    x_op = x.astype(operand_dtype)
    w_op = w_t.astype(operand_dtype)
    b_op = bias.astype(jnp.float32).reshape(1, C)

    # Tiles capped by the (padded) problem; pad so the output's lane (last) dim
    # is a multiple of 128 -> unmasked, lane-dense stores.
    tm = min(tm, _round_up(B, 8))
    tn = min(tn, _round_up(C, 128))
    tk = min(tk, _round_up(E, 128))
    Mp, Np, Kp = _round_up(B, tm), _round_up(C, tn), _round_up(E, tk)

    x_p = jnp.pad(x_op, ((0, Mp - B), (0, Kp - E)))
    w_p = jnp.pad(w_op, ((0, Kp - E), (0, Np - C)))
    b_p = jnp.pad(b_op, ((0, 0), (0, Np - C)))

    grid = (Mp // tm, Np // tn, Kp // tk)

    cost = pl.CostEstimate(
        flops=2 * B * E * C,
        transcendentals=0,
        bytes_accessed=x.dtype.itemsize * (B * E + E * C + B * C),
    )

    out_p = pl.pallas_call(
        linear_kernel,
        out_shape=jax.ShapeDtypeStruct((Mp, Np), out_dtype),
        grid_spec=pltpu.PrefetchScalarGridSpec(
            num_scalar_prefetch=0,
            grid=grid,
            in_specs=[
                pl.BlockSpec((tm, tk), lambda i, j, k: (i, k)),   # x tile
                pl.BlockSpec((tk, tn), lambda i, j, k: (k, j)),   # W tile
                pl.BlockSpec((1, tn), lambda i, j, k: (0, j)),    # bias row
            ],
            out_specs=pl.BlockSpec((tm, tn), lambda i, j, k: (i, j)),
            scratch_shapes=[pltpu.VMEM((tm, tn), jnp.float32)],
        ),
        compiler_params=pltpu.CompilerParams(
            dimension_semantics=("parallel", "parallel", "arbitrary"),
            vmem_limit_bytes=32 * 1024 * 1024,
        ),
        cost_estimate=cost,
    )(x_p, w_p, b_p)

    # Slice the padding back off.
    return out_p[:B, :C]


if __name__ == "__main__":
    # Small shapes consistent with SimpleClassifier(embed_size=32, n_classes=16).
    batch, embed_size, n_classes = 8, 32, 16

    key = jax.random.PRNGKey(0)
    kx, kw, kb = jax.random.split(key, 3)

    # Mimic torch.nn.Linear init: uniform(-1/sqrt(E), 1/sqrt(E)).
    bound = 1.0 / (embed_size ** 0.5)
    weight = jax.random.uniform(kw, (n_classes, embed_size), jnp.float32, -bound, bound)
    bias = jax.random.uniform(kb, (n_classes,), jnp.float32, -bound, bound)
    x = jax.random.normal(kx, (batch, embed_size), jnp.float32)

    y = simple_classifier_forward(x, weight, bias)
    y = jax.block_until_ready(y)

    # Reference: same bf16-cast operands, f32 math (matches the kernel's
    # bf16-operand / f32-accumulate contract).
    x_bf = x.astype(jnp.bfloat16).astype(jnp.float32)
    w_bf = weight.astype(jnp.bfloat16).astype(jnp.float32)
    y_ref = x_bf @ w_bf.T + bias

    assert y.shape == (batch, n_classes)
    assert jnp.allclose(y, y_ref, atol=1e-3, rtol=1e-3)

    print("KERNEL_OK")
</pallas_src>

<mosaic_0001>
module attributes {stable_mosaic.version = 11 : i64} {
  func.func @linear_kernel(%arg0: i32, %arg1: i32, %arg2: i32, %arg3: memref<8x128xbf16, #tpu.memory_space<vmem>>, %arg4: memref<128x128xbf16, #tpu.memory_space<vmem>>, %arg5: memref<1x128xf32, #tpu.memory_space<vmem>>, %arg6: memref<8x128xf32, #tpu.memory_space<vmem>>, %arg7: memref<8x128xf32, #tpu.memory_space<vmem>>) attributes {dimension_semantics = [#tpu.dimension_semantics<parallel>, #tpu.dimension_semantics<parallel>, #tpu.dimension_semantics<arbitrary>], iteration_bounds = array<i64: 1, 1, 1>, scalar_prefetch = 0 : i64, scratch_operands = 1 : i64, tpu.core_type = #tpu.core_type<tc>, window_params = [{transform_indices = @transform_0, window_bounds = array<i64: 8, 128>}, {transform_indices = @transform_1, window_bounds = array<i64: 128, 128>}, {transform_indices = @transform_2, window_bounds = array<i64: 1, 128>}, {transform_indices = @transform_3, window_bounds = array<i64: 8, 128>}]} {
    %c0_i32 = arith.constant 0 : i32
    %0 = arith.cmpi eq, %arg2, %c0_i32 : i32
    %1 = arith.extui %0 : i1 to i32
    %c0_i32_0 = arith.constant 0 : i32
    %2 = arith.cmpi ne, %1, %c0_i32_0 : i32
    scf.if %2 {
      %cst_10 = arith.constant 0.000000e+00 : f32
      %12 = vector.broadcast %cst_10 : f32 to vector<8x128xf32>
      %c0_11 = arith.constant 0 : index
      %c0_12 = arith.constant 0 : index
      %13 = vector.load %arg7[%c0_11, %c0_12] : memref<8x128xf32, #tpu.memory_space<vmem>>, vector<8x128xf32>
      tpu.vector_store %arg7[%c0_11, %c0_12], %12 {strides = array<i32>} : memref<8x128xf32, #tpu.memory_space<vmem>>, vector<8x128xf32>,
    } else {
    }
    %c0 = arith.constant 0 : index
    %c0_1 = arith.constant 0 : index
    %3 = vector.load %arg7[%c0, %c0_1] : memref<8x128xf32, #tpu.memory_space<vmem>>, vector<8x128xf32>
    %c0_2 = arith.constant 0 : index
    %c0_3 = arith.constant 0 : index
    %4 = vector.load %arg3[%c0_2, %c0_3] : memref<8x128xbf16, #tpu.memory_space<vmem>>, vector<8x128xbf16>
    %c0_4 = arith.constant 0 : index
    %c0_5 = arith.constant 0 : index
    %5 = vector.load %arg4[%c0_4, %c0_5] : memref<128x128xbf16, #tpu.memory_space<vmem>>, vector<128x128xbf16>
    %cst = arith.constant dense<0.000000e+00> : vector<8x128xf32>
    %6 = tpu.matmul %4, %5, %cst {dimension_numbers = #tpu.dot_dimension_numbers<[1], [0], [0], [1], [0, 0, 1, 1], [], []>} : vector<8x128xbf16>, vector<128x128xbf16>, vector<8x128xf32> -> vector<8x128xf32>
    %7 = arith.addf %3, %6 : vector<8x128xf32>
    %c0_6 = arith.constant 0 : index
    %c0_7 = arith.constant 0 : index
    %8 = vector.load %arg7[%c0_6, %c0_7] : memref<8x128xf32, #tpu.memory_space<vmem>>, vector<8x128xf32>
    tpu.vector_store %arg7[%c0_6, %c0_7], %7 {strides = array<i32>} : memref<8x128xf32, #tpu.memory_space<vmem>>, vector<8x128xf32>,
    %c0_i32_8 = arith.constant 0 : i32
    %9 = arith.cmpi eq, %arg2, %c0_i32_8 : i32
    %10 = arith.extui %9 : i1 to i32
    %c0_i32_9 = arith.constant 0 : i32
    %11 = arith.cmpi ne, %10, %c0_i32_9 : i32
    scf.if %11 {
      %c0_10 = arith.constant 0 : index
      %c0_11 = arith.constant 0 : index
      %12 = vector.load %arg7[%c0_10, %c0_11] : memref<8x128xf32, #tpu.memory_space<vmem>>, vector<8x128xf32>
      %c0_12 = arith.constant 0 : index
      %c0_13 = arith.constant 0 : index
      %13 = vector.load %arg5[%c0_12, %c0_13] : memref<1x128xf32, #tpu.memory_space<vmem>>, vector<1x128xf32>
      %14 = vector.broadcast %13 : vector<1x128xf32> to vector<8x128xf32>
      %15 = arith.addf %12, %14 : vector<8x128xf32>
      %c0_14 = arith.constant 0 : index
      %c0_15 = arith.constant 0 : index
      %16 = vector.load %arg6[%c0_14, %c0_15] : memref<8x128xf32, #tpu.memory_space<vmem>>, vector<8x128xf32>
      tpu.vector_store %arg6[%c0_14, %c0_15], %15 {strides = array<i32>} : memref<8x128xf32, #tpu.memory_space<vmem>>, vector<8x128xf32>,
    } else {
    }
    return
  }
  func.func @transform_0(%arg0: i32, %arg1: i32, %arg2: i32) -> (i32, i32) {
    %c0_i32 = arith.constant 0 : i32
    return %arg0, %arg2 : i32, i32
  }
  func.func @transform_1(%arg0: i32, %arg1: i32, %arg2: i32) -> (i32, i32) {
    %c0_i32 = arith.constant 0 : i32
    return %arg2, %arg1 : i32, i32
  }
  func.func @transform_2(%arg0: i32, %arg1: i32, %arg2: i32) -> (i32, i32) {
    %c0_i32 = arith.constant 0 : i32
    %c0_i32_0 = arith.constant 0 : i32
    return %c0_i32, %arg1 : i32, i32
  }
  func.func @transform_3(%arg0: i32, %arg1: i32, %arg2: i32) -> (i32, i32) {
    %c0_i32 = arith.constant 0 : i32
    return %arg0, %arg1 : i32, i32
  }
}

</mosaic_0001>

<bundles_post_ra>
// kernel: tpu_custom_call.1
= control target key start
LH: loop header
LB: loop body
LE: loop exit
PB: predicated region body
PF: predicated region fallthrough
CT: control target
= control target key end

     0   :  { %8 = vsyncpa [#allocation4], 0  ;;  %s382_s0 = inlined_call_operand.hbm [shape: bf16[8,128], index: 0, kind: input, shape index: {}]   ;;  %s383_s1 = inlined_call_operand.hbm [shape: bf16[128,128], index: 1, kind: input, shape index: {}]   ;;  %s384_s2 = inlined_call_operand.vmem [shape: f32[1,128], index: 2, kind: input, shape index: {}]   ;;  %s385_s3 = inlined_call_operand.hbm [shape: f32[8,128], index: 3, kind: output, shape index: {}]  }
   0x1   :  { %9 = vsyncpa [#allocation7], 0 }
   0x2   :  { %10 = vsyncpa [#allocation5], 0  ;;  %s309_s12 = smov [#allocation3]   ;;  %s310_s14 = smov [#allocation6]  }
   0x3   :  { %s17_s13 = sshll.u32 %s309_s12, 4  ;;  %s26_s15 = sshll.u32 %s310_s14, 4  ;;  %s18_s13 = int_to_ptr.vmem [resolvable:$true] %s17_s13  ;;  %s336_s15 = int_to_ptr.vmem [resolvable:$true] %s26_s15 }
   0x4   :  { %s237_s18 = scalar_lea.hbm %s382_s0, 64 }
   0x5   :  { %p238_p0 = scmp.ne.s32.totalorder %s382_s0, %s237_s18  ;;  %p241_p1 = scmp.lt.u32.totalorder %s237_s18, %s382_s0 }
   0x7   :  { %p243_p2 = pnand %p241_p1, %p238_p0 }
   0x9   :  { %246 = shalt.err (!%p243_p2)
}
   0xa   :  { %s247_s23 = scalar_lea.vmem %s18_s13, 64  ;;  %p252_p4 = scmp.lt.s32.totalorder %s18_s13, %s18_s13 }
   0xb   :  { %p248_p3 = scmp.ne.s32.totalorder %s18_s13, %s247_s23  ;;  %p253_p5 = scmp.lt.s32.totalorder %s247_s23, %s247_s23 }
   0xd   :  { %p254_p6 = por %p253_p5, %p252_p4 }
   0xf   :  { %p255_p7 = pnand %p254_p6, %p248_p3 }
  0x11   :  { %258 = shalt.err (!%p255_p7)
}
  0x12   :  { %20 = dma.hbm_to_vmem [thread:$0]  %s382_s0, 64, %s18_s13, [#allocation4]  }
  0x13   :  { %s259_s28 = scalar_lea.hbm %s383_s1, 1024 }
  0x14   :  { %p260_p8 = scmp.ne.s32.totalorder %s383_s1, %s259_s28  ;;  %p263_p9 = scmp.lt.u32.totalorder %s259_s28, %s383_s1 }
  0x16   :  { %p265_p10 = pnand %p263_p9, %p260_p8 }
  0x18   :  { %268 = shalt.err (!%p265_p10)
}
  0x19   :  { %s269_s6 = scalar_lea.vmem %s336_s15, 1024  ;;  %p274_p12 = scmp.lt.s32.totalorder %s336_s15, %s336_s15 }
  0x1a   :  { %p270_p11 = scmp.ne.s32.totalorder %s336_s15, %s269_s6  ;;  %p275_p13 = scmp.lt.s32.totalorder %s269_s6, %s269_s6 }
  0x1c   :  { %p276_p0 = por %p275_p13, %p274_p12 }
  0x1e   :  { %p277_p1 = pnand %p276_p0, %p270_p11 }
  0x20   :  { %280 = shalt.err (!%p277_p1)
}
  0x21   :  { %s311_s0 = smov 64   ;;  %s312_s7 = smov 4  }
  0x22   :  { %32 = dma.hbm_to_vmem [thread:$0]  %s383_s1, 1024, %s336_s15, [#allocation7], %s311_s0, %s311_s0, %s312_s7  }
  0x23   :  { %303 = dma.done.wait [#allocation4], 64  }
  0x24   :  { %304 = vsyncadd [#allocation4], 4294967232 }
  0x25   :  { %305 = dma.done.wait [#allocation7], 1024  }
  0x26   :  { %306 = vsyncadd [#allocation7], 4294966272  ;;  %v313_v0 = vmov 0.0   ;;  %vm314_vm0 = vmmov 0   ;;  %v229_v1 = vld [vmem:[#allocation6] sm:$0xff]   ;;  %v230_v2 = vld [vmem:[#allocation6 + $0x8] sm:$0xff]  }
  0x27   :  { %202 = vmatprep.subr.bf16.mxu0 %v313_v0  ;;  %218 = vmatprep.mubr.msk.bf16.mxu0 %vm314_vm0, %v313_v0  ;;  %v231_v3 = vld [vmem:[#allocation6 + $0x10] sm:$0xff]   ;;  %v232_v4 = vld [vmem:[#allocation6 + $0x18] sm:$0xff]   ;;  %v233_v5 = vld [vmem:[#allocation6 + $0x20] sm:$0xff]   ;;  %s315_s11 = smov [#allocation8]  }
  0x28   :  { %203 = vmatpush3.bf16.msra.mxu0 %v229_v1  ;;  %v234_v6 = vld [vmem:[#allocation6 + $0x28] sm:$0xff]   ;;  %v235_v7 = vld [vmem:[#allocation6 + $0x30] sm:$0xff]   ;;  %v236_v8 = vld [vmem:[#allocation6 + $0x38] sm:$0xff]   ;;  %s174_s12 = sshll.u32 %s315_s11, 4  ;;  %s175_s12 = int_to_ptr.vmem [resolvable:$true] %s174_s12 }
  0x29   :  { %204 = vmatprep.subr.bf16.mxu0 %v313_v0  ;;  %v48_v9 = vld [vmem:[#allocation3] sm:$0xf]  ;;  %s281_s13 = scalar_lea.vmem %s175_s12, 128  ;;  %p286_p3 = scmp.lt.s32.totalorder %s175_s12, %s175_s12 }
  0x2a   :  { %v192_v10 = vld [vmem:[%s384_s2] ss:$0 sm:$0xff]  ;;  %p282_p2 = scmp.ne.s32.totalorder %s175_s12, %s281_s13  ;;  %p287_p4 = scmp.lt.s32.totalorder %s281_s13, %s281_s13 }
  0x2c   :  { %205 = vmatpush3.bf16.msra.mxu0 %v230_v2  ;;  %p288_p5 = por %p287_p4, %p286_p3 }
  0x2d   :  { %206 = vmatprep.subr.bf16.mxu0 %v313_v0 }
  0x2e   :  { %p289_p6 = pnand %p288_p5, %p282_p2 }
  0x30   :  { %207 = vmatpush3.bf16.msra.mxu0 %v231_v3 }
  0x31   :  { %208 = vmatprep.subr.bf16.mxu0 %v313_v0 }
  0x34   :  { %209 = vmatpush3.bf16.msra.mxu0 %v232_v4 }
  0x35   :  { %210 = vmatprep.subr.bf16.mxu0 %v313_v0 }
  0x38   :  { %211 = vmatpush3.bf16.msra.mxu0 %v233_v5 }
  0x39   :  { %212 = vmatprep.subr.bf16.mxu0 %v313_v0 }
  0x3c   :  { %213 = vmatpush3.bf16.msra.mxu0 %v234_v6 }
  0x3d   :  { %214 = vmatprep.subr.bf16.mxu0 %v313_v0 }
  0x40   :  { %215 = vmatpush3.bf16.msra.mxu0 %v235_v7 }
  0x41   :  { %216 = vmatprep.subr.bf16.mxu0 %v313_v0 }
  0x44   :  { %217 = vmatpush3.bf16.msra.mxu0 %v236_v8 }
  0x47   :  { %219 = vmatmul.mubr.bf16.vlgmr.msra.gmra.mrb[0].mxu0 %v48_v9 }
 0x11a   :  { %v147_v11 = vpop.f32.mrb[0].mxu0 }
 0x11b   :  { %v166_v12 = vadd.f32 %v192_v10, %v147_v11  ;;  %v220_v13 = vpop.f32.mrb[1].mxu0 }
 0x11c   :  { %v150_v14 = vpop.f32.mrb[2].mxu0 }
 0x11d   :  { %167 = vst [vmem:[#allocation8] sm:$0xff] %v166_v12  ;;  %v221_v15 = vpop.f32.mrb[3].mxu0 }
 0x11e   :  { %292 = shalt.err (!%p289_p6)
}
 0x11f   :  { %s293_s2 = scalar_lea.hbm %s385_s3, 128 }
 0x120   :  { %p294_p7 = scmp.ne.s32.totalorder %s385_s3, %s293_s2  ;;  %p297_p8 = scmp.lt.u32.totalorder %s293_s2, %s385_s3 }
 0x122   :  { %p299_p9 = pnand %p297_p8, %p294_p7 }
 0x124   :  { %302 = shalt.err (!%p299_p9)
}
 0x125   :  { %177 = dma.vmem_to_hbm [thread:$0]  %s175_s12, 128, %s385_s3, [#allocation5]  }
 0x126   :  { %307 = dma.done.wait [#allocation5], 128  }
 0x127   :  { %308 = vsyncadd [#allocation5], 4294967168 }
 0x128   :  { %181 = vsyncpa [#allocation4], 1 }
 0x129   :  { %182 = vsyncpa [#allocation7], 1 }
 0x12a   :  { %183 = vsyncpa [#allocation5], 1 }

</bundles_post_ra>
